<compile_context>
chip_gen: v7x
topology: tpu7x:2x2x1
jax: 0.10.0
libtpu: 0.0.40
codegen_flags: <defaults>
</compile_context>

<pallas_src>
import functools

import jax
import jax.numpy as jnp
from jax.experimental import pallas as pl
from jax.experimental.pallas import tpu as pltpu


def _round_up(x, m):
    return (x + m - 1) // m * m


def _convdown_gemm_kernel(p_ref, w_ref, b_ref, o_ref):
    # p_ref: (K, tm)        space-to-depth patches, output voxels on the lane axis
    # w_ref: (Cout_p8, K)   packed weights, Cout padded only to a multiple of 8
    # b_ref: (Cout_p8, 1)   bias (broadcasts across the lane axis)
    # o_ref: (Cout_p8, tm)  lane-dense output tile
    acc = jnp.dot(w_ref[...], p_ref[...], preferred_element_type=jnp.float32)
    acc = acc + b_ref[...]
    o_ref[...] = jnp.maximum(acc, 0.0).astype(o_ref.dtype)


def downsampling_conv3d_relu_pallas(x_ncdhw, w_oidhw, b, stride=2, tm=512,
                                    compute_dtype=None):
    """Conv3d(kernel=stride, stride=stride, padding=0) + bias + ReLU.

    x_ncdhw: (N, Cin, D, H, W) float32
    w_oidhw: (Cout, Cin, s, s, s) float32 (PyTorch layout)
    b      : (Cout,) float32
    returns: (N, Cout, D//s, H//s, W//s) float32
    """
    s = int(stride)
    N, Cin, D, H, W = x_ncdhw.shape
    Cout = w_oidhw.shape[0]
    Do, Ho, Wo = D // s, H // s, W // s
    K = s * s * s * Cin
    Mn = Do * Ho * Wo                      # output voxels per batch element

    # VALID conv with kernel==stride ignores any trailing remainder rows.
    x = x_ncdhw[:, :, :Do * s, :Ho * s, :Wo * s]

    # Space-to-depth im2col, built directly in the transposed (K-major)
    # orientation: (N,Cin,Do,s,Ho,s,Wo,s) -> (N, Cin,kd,kh,kw, Do,Ho,Wo)
    # -> (N, K, Mn).
    # TODO(synk): this single relayout still costs one extra HBM pass over the
    # input; fusing it into the kernel (VMEM shuffle of raw NCDHW slabs) needs
    # Mosaic strided-slice / reshape lowering and is left out for robustness.
    x = x.reshape(N, Cin, Do, s, Ho, s, Wo, s)
    x = jnp.transpose(x, (0, 1, 3, 5, 7, 2, 4, 6))
    patches_t = x.reshape(N, K, Mn)

    # Weights: (Cout, Cin, kd, kh, kw) -> (Cout, K); flattened row order
    # (cin, kd, kh, kw) matches the patch K order above.  Pad Cout only up to
    # the sublane quantum (8) -- no lane padding of the output channel axis.
    cp = _round_up(Cout, 8)
    w2d = jnp.pad(w_oidhw.reshape(Cout, K), ((0, cp - Cout), (0, 0)))
    b2 = jnp.pad(b, (0, cp - Cout)).reshape(cp, 1).astype(jnp.float32)

    if compute_dtype is not None:
        patches_t = patches_t.astype(compute_dtype)
        w2d = w2d.astype(compute_dtype)

    # Row (lane) tile: big enough to approach the HBM roofline, small enough
    # to keep the parallel grid >= ~8 steps for v7x's two TensorCores.
    tm = max(128, min(_round_up(int(tm), 128), _round_up(Mn, 128)))
    while tm > 128 and N * (-(-Mn // tm)) < 8:
        tm = max(128, _round_up(tm // 2, 128))
    Mp = _round_up(Mn, tm)
    if Mp != Mn:
        patches_t = jnp.pad(patches_t, ((0, 0), (0, 0), (0, Mp - Mn)))

    ebytes = patches_t.dtype.itemsize
    grid = (N, Mp // tm)

    # Double-buffered patch & output tiles + resident weights/bias.
    vmem_need = (2 * K * tm * ebytes + 2 * cp * tm * 4 +
                 2 * cp * K * ebytes + 2 * cp * 4)
    vmem_limit = int(min(60 * 2 ** 20, max(32 * 2 ** 20, 2 * vmem_need)))

    cost = pl.CostEstimate(
        flops=2 * N * Mn * K * Cout,
        transcendentals=0,
        bytes_accessed=ebytes * (N * K * Mp + cp * K) + 4 * (cp + N * cp * Mp),
    )

    out = pl.pallas_call(
        _convdown_gemm_kernel,
        out_shape=jax.ShapeDtypeStruct((N, cp, Mp), jnp.float32),
        grid_spec=pltpu.PrefetchScalarGridSpec(
            num_scalar_prefetch=0,
            grid=grid,
            in_specs=[
                pl.BlockSpec((None, K, tm), lambda n, j: (n, 0, j)),  # patches
                pl.BlockSpec((cp, K), lambda n, j: (0, 0)),           # weights
                pl.BlockSpec((cp, 1), lambda n, j: (0, 0)),           # bias
            ],
            out_specs=pl.BlockSpec((None, cp, tm), lambda n, j: (n, 0, j)),
        ),
        compiler_params=pltpu.CompilerParams(
            dimension_semantics=("parallel", "parallel"),
            vmem_limit_bytes=vmem_limit),
        cost_estimate=cost,
    )(patches_t, w2d, b2)

    # Restore NCDHW: slice off padding (no-op when cp==Cout and Mp==Mn) and a
    # free reshape -- no transpose, no extra HBM relayout of the output.
    out = out[:, :Cout, :Mn].reshape(N, Cout, Do, Ho, Wo)
    return out


class DownsamplingConvBlockPallas:
    """Pallas equivalent of PyTorch DownsamplingConvBlock (normalization='none')."""

    def __init__(self, n_filters_in, n_filters_out, stride=2,
                 normalization='none', *, key):
        if normalization != 'none':
            # TODO(synk): batchnorm/groupnorm/instancenorm branches not implemented.
            raise NotImplementedError("only normalization='none' is implemented")
        self.stride = stride
        k_w, k_b = jax.random.split(key)
        fan_in = n_filters_in * stride ** 3
        bound = 1.0 / float(fan_in) ** 0.5
        # PyTorch Conv3d default init: U(-1/sqrt(fan_in), 1/sqrt(fan_in)).
        self.w = jax.random.uniform(
            k_w, (n_filters_out, n_filters_in, stride, stride, stride),
            jnp.float32, -bound, bound)
        self.b = jax.random.uniform(
            k_b, (n_filters_out,), jnp.float32, -bound, bound)

    def __call__(self, x_ncdhw):
        return downsampling_conv3d_relu_pallas(
            x_ncdhw, self.w, self.b, stride=self.stride)


def _reference_forward(x_ncdhw, w_oidhw, b, stride=2):
    """Pure-JAX reference: stride-s, kernel-s, padding-0 conv + bias + ReLU."""
    s = stride
    y = jax.lax.conv_general_dilated(
        x_ncdhw, w_oidhw, window_strides=(s, s, s), padding='VALID',
        dimension_numbers=('NCDHW', 'OIDHW', 'NCDHW'))
    y = y + b.reshape(1, -1, 1, 1, 1)
    return jnp.maximum(y, 0.0)


if __name__ == "__main__":
    key = jax.random.PRNGKey(0)
    key, x_key, p_key = jax.random.split(key, 3)

    # Small shapes consistent with the module: batch=2, C_in=4, D=H=W=16,
    # C_out=8, stride=2 (-> output spatial 8^3).
    N, Cin, D, H, W = 2, 4, 16, 16, 16
    Cout, stride = 8, 2

    x = jax.random.normal(x_key, (N, Cin, D, H, W), jnp.float32)
    block = DownsamplingConvBlockPallas(Cin, Cout, stride=stride, key=p_key)

    fwd = jax.jit(functools.partial(
        downsampling_conv3d_relu_pallas, stride=stride))
    out = jax.block_until_ready(fwd(x, block.w, block.b))

    ref = _reference_forward(x, block.w, block.b, stride=stride)
    assert out.shape == (N, Cout, D // stride, H // stride, W // stride), out.shape
    max_err = float(jnp.max(jnp.abs(out - ref)))
    assert jnp.allclose(out, ref, atol=1e-4, rtol=1e-4), max_err

    print("KERNEL_OK")
</pallas_src>

<mosaic_0001>
module attributes {stable_mosaic.version = 11 : i64} {
  func.func @_convdown_gemm_kernel(%arg0: i32, %arg1: i32, %arg2: memref<1x32x128xf32, #tpu.memory_space<vmem>>, %arg3: memref<8x32xf32, #tpu.memory_space<vmem>>, %arg4: memref<8x1xf32, #tpu.memory_space<vmem>>, %arg5: memref<1x8x128xf32, #tpu.memory_space<vmem>>) attributes {dimension_semantics = [#tpu.dimension_semantics<parallel>, #tpu.dimension_semantics<parallel>], iteration_bounds = array<i64: 2, 4>, scalar_prefetch = 0 : i64, scratch_operands = 0 : i64, tpu.core_type = #tpu.core_type<tc>, window_params = [{transform_indices = @transform_0, window_bounds = array<i64: 1, 32, 128>}, {pipeline_mode = #tpu.pipeline_mode<synchronous>, transform_indices = @transform_1, window_bounds = array<i64: 8, 32>}, {pipeline_mode = #tpu.pipeline_mode<synchronous>, transform_indices = @transform_2, window_bounds = array<i64: 8, 1>}, {transform_indices = @transform_3, window_bounds = array<i64: 1, 8, 128>}]} {
    %c0 = arith.constant 0 : index
    %c0_0 = arith.constant 0 : index
    %0 = vector.load %arg3[%c0, %c0_0] : memref<8x32xf32, #tpu.memory_space<vmem>>, vector<8x32xf32>
    %c0_1 = arith.constant 0 : index
    %c0_2 = arith.constant 0 : index
    %c0_3 = arith.constant 0 : index
    %1 = vector.load %arg2[%c0_1, %c0_2, %c0_3] : memref<1x32x128xf32, #tpu.memory_space<vmem>>, vector<1x32x128xf32>
    %2 = vector.shape_cast %1 : vector<1x32x128xf32> to vector<32x128xf32>
    %cst = arith.constant dense<0.000000e+00> : vector<8x128xf32>
    %3 = tpu.matmul %0, %2, %cst {dimension_numbers = #tpu.dot_dimension_numbers<[1], [0], [0], [1], [0, 0, 1, 1], [], []>} : vector<8x32xf32>, vector<32x128xf32>, vector<8x128xf32> -> vector<8x128xf32>
    %c0_4 = arith.constant 0 : index
    %c0_5 = arith.constant 0 : index
    %4 = vector.load %arg4[%c0_4, %c0_5] : memref<8x1xf32, #tpu.memory_space<vmem>>, vector<8x1xf32>
    %5 = vector.broadcast %4 : vector<8x1xf32> to vector<8x128xf32>
    %6 = arith.addf %3, %5 : vector<8x128xf32>
    %cst_6 = arith.constant 0.000000e+00 : f32
    %7 = vector.broadcast %cst_6 : f32 to vector<8x128xf32>
    %8 = arith.maximumf %6, %7 : vector<8x128xf32>
    %c0_7 = arith.constant 0 : index
    %c0_8 = arith.constant 0 : index
    %c0_9 = arith.constant 0 : index
    %9 = vector.load %arg5[%c0_7, %c0_8, %c0_9] : memref<1x8x128xf32, #tpu.memory_space<vmem>>, vector<1x8x128xf32>
    %10 = vector.shape_cast %9 : vector<1x8x128xf32> to vector<8x128xf32>
    %11 = vector.shape_cast %8 : vector<8x128xf32> to vector<1x8x128xf32>
    tpu.vector_store %arg5[%c0_7, %c0_8, %c0_9], %11 {strides = array<i32>} : memref<1x8x128xf32, #tpu.memory_space<vmem>>, vector<1x8x128xf32>,
    return
  }
  func.func @transform_0(%arg0: i32, %arg1: i32) -> (i32, i32, i32) {
    %c0_i32 = arith.constant 0 : i32
    %c0_i32_0 = arith.constant 0 : i32
    return %arg0, %c0_i32, %arg1 : i32, i32, i32
  }
  func.func @transform_1(%arg0: i32, %arg1: i32) -> (i32, i32) {
    %c0_i32 = arith.constant 0 : i32
    %c0_i32_0 = arith.constant 0 : i32
    %c0_i32_1 = arith.constant 0 : i32
    return %c0_i32, %c0_i32_0 : i32, i32
  }
  func.func @transform_2(%arg0: i32, %arg1: i32) -> (i32, i32) {
    %c0_i32 = arith.constant 0 : i32
    %c0_i32_0 = arith.constant 0 : i32
    %c0_i32_1 = arith.constant 0 : i32
    return %c0_i32, %c0_i32_0 : i32, i32
  }
  func.func @transform_3(%arg0: i32, %arg1: i32) -> (i32, i32, i32) {
    %c0_i32 = arith.constant 0 : i32
    %c0_i32_0 = arith.constant 0 : i32
    return %arg0, %c0_i32, %arg1 : i32, i32, i32
  }
}

</mosaic_0001>

<bundles_post_ra>
// kernel: downsampling_conv3d_relu_pallas.1
= control target key start
LH: loop header
LB: loop body
LE: loop exit
PB: predicated region body
PF: predicated region fallthrough
CT: control target
= control target key end

     0   :  { %s593_s12 = smov 0   ;;  %s595_s13 = smov 0   ;;  %s690_s0 = inlined_call_operand.vmem [shape: f32[2,32,512], index: 0, kind: input, shape index: {}]   ;;  %s691_s1 = inlined_call_operand.vmem [shape: f32[8,32], index: 1, kind: input, shape index: {}]   ;;  %s692_s2 = inlined_call_operand.vmem [shape: f32[8,1], index: 2, kind: input, shape index: {}]   ;;  %s693_s3 = inlined_call_operand.vmem [shape: f32[2,8,512], index: 3, kind: output, shape index: {}]  }
   0x1   :  { %s597_s14 = smov 0   ;;  %s599_s15 = smov 0  }
   0x2   :  { %s601_s16 = smov 0   ;;  %s603_s17 = smov 0  }
   0x3   :  { %s605_s18 = smov 0  }
   0x4 LB: > { %s22_s19 = sadd.s32 1, %s559_s16  ;;  %s25_s20 = sadd.s32 1, %s563_s17  ;;  %s567_s18 = sphi %s605_s18, %s13_s18   ;;  %s563_s17 = sphi %s603_s17, %s699_s17   ;;  %s559_s16 = sphi %s601_s16, %s698_s16   ;;  %s555_s15 = sphi %s599_s15, %s697_s15   ;;  %s551_s14 = sphi %s597_s14, %s696_s14   ;;  %s547_s13 = sphi %s595_s13, %s695_s13   ;;  %s543_s12 = sphi %s593_s12, %s694_s12  }
   0x5   : > { %p23_p0 = scmp.ge.s32.totalorder %s22_s19, 4  ;;  %p41_p1 = scmp.ne.s32.totalorder %s547_s13, %s543_s12 }
   0x6   : > { %p42_p2 = scmp.eq.s32.totalorder %s567_s18, 0  ;;  %s34_s24 = sadd.s32 1, %s547_s13 }
   0x7   : > { %s701_s19 = smov (%p23_p0, %s22_s19), 0  ;;  %s703_s20 = smov (!%p23_p0, %s25_s20), %s563_s17 }
   0x8   : > { %p43_p3 = por %p42_p2, %p41_p1  ;;  %p27_p4 = scmp.ge.s32.totalorder %s703_s20, 2 }
   0x9   : > { %s30_s21 = ssub.s32 %s559_s16, %s701_s19  ;;  %p419_p6 = scmp.ge.s32.totalorder %s567_s18, 8 }
   0xa   : > { %s705_s20 = smov (%p27_p4, %s703_s20), 0 }
   0xb   : > { %s29_s22 = ssub.s32 %s563_s17, %s705_s20  ;;  %143 = sbr.rel (%p419_p6) target bundleno = 28 (0x1c), region = 24 }
   0xc   : > { %s31_s23 = sor.u32 %s30_s21, %s29_s22 }
   0xd   : > { %p32_p5 = scmp.eq.s32.totalorder %s31_s23, 0 }
   0xf   : > { %s644_s25 = scalar_select %p32_p5, %s547_s13, %s34_s24  }
  0x12   : > { %146 = sbr.rel (!%p43_p3) target bundleno = 28 (0x1c), region = 28  ;;  %s148_s26 = sand.u32 (%p43_p3), 1, %s547_s13  }
  0x13   : > { %s421_s27 = sshll.u32 (%p43_p3), %s563_s17, 4  ;;  %s420_s28 = sshll.u32 (%p43_p3), %s148_s26, 5 }
  0x14   : > { %s152_s29 = sadd.s32 (%p43_p3), %s559_s16, %s421_s27  ;;  %s150_s7 = scalar_lea.vmem (%p43_p3), [#allocation2], %s420_s28 }
  0x15   : > { %s422_s30 = sshll.u32 (%p43_p3), %s152_s29, 3 }
  0x16   : > { %s154_s6 = scalar_lea.vmem (%p43_p3), %s690_s0, %s422_s30 }
  0x17   : > { %v188_v0 = vld [vmem:[%s154_s6] sm:$0xff] (%p43_p3) }
  0x18   : > { %v190_v1 = vld [vmem:[%s154_s6 + $0x20] sm:$0xff] (%p43_p3)  ;;  %189 = vst [vmem:[%s150_s7] sm:$0xff] (%p43_p3), %v188_v0 }
  0x19   : > { %v192_v2 = vld [vmem:[%s154_s6 + $0x40] sm:$0xff]  ;;  %191 = vst [vmem:[%s150_s7 + $0x8] sm:$0xff] %v190_v1 }
  0x1a   : > { %193 = vst [vmem:[%s150_s7 + $0x10] sm:$0xff] %v192_v2  ;;  %v194_v3 = vld [vmem:[%s154_s6 + $0x60] sm:$0xff] }
  0x1b   : > { %195 = vst [vmem:[%s150_s7 + $0x18] sm:$0xff] %v194_v3 }
  0x1c PF: > { %p423_p7 = scmp.ge.s32.totalorder %s567_s18, 1  ;;  %p200_p8 = scmp.lt.s32.totalorder %s567_s18, 9 }
  0x1e   : > { %p201_p9 = pnand %p423_p7, %p200_p8 }
  0x1f   : > { %s207_s8 = sand.u32 (!%p201_p9), 1, %s543_s12   ;;  %v569_v4 = vmov (!%p201_p9), 0.0|0.0   ;;  %vm570_vm0 = vmmov (!%p201_p9), 0   ;;  %v571_v5 = vmov (!%p201_p9), 0.0   ;;  %v246_v6 = vld [vmem:[%s692_s2] sm:$0xff] (!%p201_p9)  ;;  %v572_v7 = vmov (!%p201_p9), 0  }
  0x20   : > { %204 = sbr.rel (%p201_p9) target bundleno = 261 (0x105), region = 66  ;;  %446 = vmatprep.subr.bf16.mxu0 (!%p201_p9), %v569_v4  ;;  %s424_s9 = sshll.u32 (!%p201_p9), %s207_s8, 5  ;;  %443 = vmatprep.mubr.msk.f32.mxu0 (!%p201_p9), %vm570_vm0, %v571_v5  ;;  %v241_v14 = vld [vmem:[%s691_s1] sm:$0xff] (!%p201_p9)  ;;  %vm252_vm1 = vcmask (!%p201_p9), 261120  }
  0x21   : > { %512 = vset.pattern.permute.xlu0 (!%p201_p9), %v572_v7  ;;  %s209_s21 = scalar_lea.vmem (!%p201_p9), [#allocation2], %s424_s9  ;;  %p233_p10 = scmp.lt.s32.totalorder (!%p201_p9), %s555_s15, 1 }
  0x22   : > { %v242_v8 = vld [vmem:[%s209_s21] sm:$0xff] (!%p201_p9)  ;;  %v243_v9 = vld [vmem:[%s209_s21 + $0x8] sm:$0xff] (!%p201_p9)  ;;  %v244_v10 = vld [vmem:[%s209_s21 + $0x10] sm:$0xff] (!%p201_p9)  ;;  %249 = vperm.xlu0 (!%p201_p9), %512, %v246_v6   ;;  %p235_p11 = scmp.lt.s32.totalorder (!%p201_p9), %s551_s14, 3 }
  0x23   : > { %v447_v11 = vpack.c.bf16 (!%p201_p9), %v243_v9, %v242_v8  ;;  %v245_v12 = vld [vmem:[%s209_s21 + $0x18] sm:$0xff] (!%p201_p9) }
  0x24   : > { %v450_v13 = vpack.c.bf16 (!%p201_p9), %v245_v12, %v244_v10 }
  0x25   : > { %448 = vmatpush3.bf16.msra.mxu0 (!%p201_p9), %v447_v11 }
  0x26   : > { %449 = vmatprep.subr.bf16.mxu0 (!%p201_p9), %v569_v4 }
  0x27   : > { %s707_s15 = smov (!%p233_p10, %s555_s15), 1  ;;  %s709_s14 = smov (!%p235_p11, %s551_s14), 3 }
  0x28   : > { %s425_s23 = sshll.u32 %s707_s15, 2 }
  0x29   : > { %451 = vmatpush3.bf16.msra.mxu0 %v450_v13  ;;  %s238_s24 = sadd.s32 %s425_s23, %s709_s14 }
  0x2a   : > { %s426_s26 = sshll.u32 %s238_s24, 3 }
  0x2b   : > { %s240_s29 = scalar_lea.vmem %s693_s3, %s426_s26 }
  0x2c   : > { %444 = vmatmul.mubr.msk.f32.vlgmr.msra.gmra.mrb[0].mxu0 %vm252_vm1, %v241_v14 }
  0xa1   : > { %v250_v15 = vpop.permute.xlu0 %249 }
  0xff   : > { %v322_v16 = vpop.f32.mrb[0].mxu0 }
 0x100   : > { %v323_v17 = vadd.f32 %v322_v16, %v250_v15  ;;  %v445_v18 = vpop.f32.mrb[1].mxu0 }
 0x102   : > { %v326_v19 = vmax.f32 %v323_v17, 0.0 }
 0x104   : > { %327 = vst [vmem:[%s240_s29] sm:$0xff] %v326_v19 }
 0x105 PF: > { %s13_s18 = sadd.s32 1, %s567_s18   ;;  %s694_s12 = smov %s547_s13 }
 0x106   : > { %p10_p12 = scmp.ge.s32.totalorder %s13_s18, 10   ;;  %s695_s13 = smov %s644_s25 }
 0x107   : > { %s696_s14 = smov %s559_s16  ;;  %s697_s15 = smov %s563_s17 }
 0x108   : > { %s698_s16 = smov %s701_s19  ;;  %s699_s17 = smov %s705_s20 }
 0x109   :  { %12 = sbr.rel (!%p10_p12) target bundleno = 4 (0x4), region = 105 }

</bundles_post_ra>
